<compile_context>
chip_gen: v7x
topology: tpu7x:2x2x1
jax: 0.10.0
libtpu: 0.0.40
codegen_flags: <defaults>
</compile_context>

<pallas_src>
import jax
import jax.numpy as jnp
from jax.experimental import pallas as pl
from jax.experimental.pallas import tpu as pltpu


# ----------------------------- Pallas kernel ------------------------------

def _mlp_fused_kernel(x_ref,
                      w1_ref, b1_ref,
                      w2_ref, b2_ref,
                      w3_ref, b3_ref,
                      w4_ref, b4_ref,
                      w5_ref, b5_ref,
                      o_ref):
    """Entire 5-layer MLP fused; weights + activations stay in VMEM."""
    h = jnp.dot(x_ref[...], w1_ref[...],
                preferred_element_type=jnp.float32) + b1_ref[...]
    h = jnp.maximum(h, 0.0)

    h = jnp.dot(h, w2_ref[...],
                preferred_element_type=jnp.float32) + b2_ref[...]
    h = jnp.maximum(h, 0.0)

    h = jnp.dot(h, w3_ref[...],
                preferred_element_type=jnp.float32) + b3_ref[...]
    h = jnp.maximum(h, 0.0)

    h = jnp.dot(h, w4_ref[...],
                preferred_element_type=jnp.float32) + b4_ref[...]
    h = jnp.maximum(h, 0.0)

    # Final layer: no activation (matches the reference forward).
    o_ref[...] = jnp.dot(h, w5_ref[...],
                         preferred_element_type=jnp.float32) + b5_ref[...]


def _vmem_spec():
    # Whole-array block, explicitly pinned to VMEM (no grid, no index_map).
    return pl.BlockSpec(memory_space=pltpu.MemorySpace.VMEM)


# ------------------------------- JAX glue ---------------------------------

@jax.jit
def bc_mlp_forward(x, params):
    """x: (B, 27) f32 -> (B, 12) f32, single fused pallas_call."""
    B = x.shape[0]
    out_c = params["w5"].shape[1]
    args = (x,
            params["w1"], params["b1"],
            params["w2"], params["b2"],
            params["w3"], params["b3"],
            params["w4"], params["b4"],
            params["w5"], params["b5"])
    return pl.pallas_call(
        _mlp_fused_kernel,
        out_shape=jax.ShapeDtypeStruct((B, out_c), jnp.float32),
        in_specs=[_vmem_spec() for _ in args],
        out_specs=_vmem_spec(),
    )(*args)


# ----------------------------- parameters ---------------------------------

def init_params(seed=0, input_channels=27, output_channels=12):
    """Mimics torch.nn.Linear default init (U(-1/sqrt(fan_in), 1/sqrt(fan_in))).

    Weights are stored pre-transposed as (in, out) so the kernel computes
    x @ W directly; biases are stored as (1, out) for clean lane broadcast.
    """
    key = jax.random.PRNGKey(seed)
    dims = [input_channels, 256, 256, 128, 64, output_channels]
    params = {}
    for i in range(5):
        fan_in, fan_out = dims[i], dims[i + 1]
        bound = 1.0 / (fan_in ** 0.5)
        key, kw, kb = jax.random.split(key, 3)
        params[f"w{i+1}"] = jax.random.uniform(
            kw, (fan_in, fan_out), jnp.float32, -bound, bound)
        params[f"b{i+1}"] = jax.random.uniform(
            kb, (1, fan_out), jnp.float32, -bound, bound)
    return params


# --------------------------------- main ------------------------------------

if __name__ == "__main__":
    params = init_params(seed=0)

    key = jax.random.PRNGKey(0)
    x = jax.random.normal(key, (2, 27), jnp.float32)   # (batch, input_channels)

    out = bc_mlp_forward(x, params)
    out = jax.block_until_ready(out)

    assert out.shape == (2, 12), out.shape
    assert out.dtype == jnp.float32
    assert bool(jnp.all(jnp.isfinite(out)))
    print("KERNEL_OK")
</pallas_src>

<mosaic_0001>
module attributes {stable_mosaic.version = 11 : i64} {
  func.func @_mlp_fused_kernel(%arg0: memref<2x27xf32, #tpu.memory_space<vmem>>, %arg1: memref<27x256xf32, #tpu.memory_space<vmem>>, %arg2: memref<1x256xf32, #tpu.memory_space<vmem>>, %arg3: memref<256x256xf32, #tpu.memory_space<vmem>>, %arg4: memref<1x256xf32, #tpu.memory_space<vmem>>, %arg5: memref<256x128xf32, #tpu.memory_space<vmem>>, %arg6: memref<1x128xf32, #tpu.memory_space<vmem>>, %arg7: memref<128x64xf32, #tpu.memory_space<vmem>>, %arg8: memref<1x64xf32, #tpu.memory_space<vmem>>, %arg9: memref<64x12xf32, #tpu.memory_space<vmem>>, %arg10: memref<1x12xf32, #tpu.memory_space<vmem>>, %arg11: memref<2x12xf32, #tpu.memory_space<vmem>>) attributes {dimension_semantics = [], scalar_prefetch = 0 : i64, scratch_operands = 0 : i64, tpu.core_type = #tpu.core_type<tc>} {
    %c0 = arith.constant 0 : index
    %c0_0 = arith.constant 0 : index
    %0 = vector.load %arg0[%c0, %c0_0] : memref<2x27xf32, #tpu.memory_space<vmem>>, vector<2x27xf32>
    %c0_1 = arith.constant 0 : index
    %c0_2 = arith.constant 0 : index
    %1 = vector.load %arg1[%c0_1, %c0_2] : memref<27x256xf32, #tpu.memory_space<vmem>>, vector<27x256xf32>
    %cst = arith.constant dense<0.000000e+00> : vector<2x256xf32>
    %2 = tpu.matmul %0, %1, %cst {dimension_numbers = #tpu.dot_dimension_numbers<[1], [0], [0], [1], [0, 0, 1, 1], [], []>} : vector<2x27xf32>, vector<27x256xf32>, vector<2x256xf32> -> vector<2x256xf32>
    %c0_3 = arith.constant 0 : index
    %c0_4 = arith.constant 0 : index
    %3 = vector.load %arg2[%c0_3, %c0_4] : memref<1x256xf32, #tpu.memory_space<vmem>>, vector<1x256xf32>
    %4 = vector.broadcast %3 : vector<1x256xf32> to vector<2x256xf32>
    %5 = arith.addf %2, %4 : vector<2x256xf32>
    %cst_5 = arith.constant 0.000000e+00 : f32
    %6 = vector.broadcast %cst_5 : f32 to vector<2x256xf32>
    %7 = arith.maximumf %5, %6 : vector<2x256xf32>
    %c0_6 = arith.constant 0 : index
    %c0_7 = arith.constant 0 : index
    %8 = vector.load %arg3[%c0_6, %c0_7] : memref<256x256xf32, #tpu.memory_space<vmem>>, vector<256x256xf32>
    %cst_8 = arith.constant dense<0.000000e+00> : vector<2x256xf32>
    %9 = tpu.matmul %7, %8, %cst_8 {dimension_numbers = #tpu.dot_dimension_numbers<[1], [0], [0], [1], [0, 0, 1, 1], [], []>} : vector<2x256xf32>, vector<256x256xf32>, vector<2x256xf32> -> vector<2x256xf32>
    %c0_9 = arith.constant 0 : index
    %c0_10 = arith.constant 0 : index
    %10 = vector.load %arg4[%c0_9, %c0_10] : memref<1x256xf32, #tpu.memory_space<vmem>>, vector<1x256xf32>
    %11 = vector.broadcast %10 : vector<1x256xf32> to vector<2x256xf32>
    %12 = arith.addf %9, %11 : vector<2x256xf32>
    %cst_11 = arith.constant 0.000000e+00 : f32
    %13 = vector.broadcast %cst_11 : f32 to vector<2x256xf32>
    %14 = arith.maximumf %12, %13 : vector<2x256xf32>
    %c0_12 = arith.constant 0 : index
    %c0_13 = arith.constant 0 : index
    %15 = vector.load %arg5[%c0_12, %c0_13] : memref<256x128xf32, #tpu.memory_space<vmem>>, vector<256x128xf32>
    %cst_14 = arith.constant dense<0.000000e+00> : vector<2x128xf32>
    %16 = tpu.matmul %14, %15, %cst_14 {dimension_numbers = #tpu.dot_dimension_numbers<[1], [0], [0], [1], [0, 0, 1, 1], [], []>} : vector<2x256xf32>, vector<256x128xf32>, vector<2x128xf32> -> vector<2x128xf32>
    %c0_15 = arith.constant 0 : index
    %c0_16 = arith.constant 0 : index
    %17 = vector.load %arg6[%c0_15, %c0_16] : memref<1x128xf32, #tpu.memory_space<vmem>>, vector<1x128xf32>
    %18 = vector.broadcast %17 : vector<1x128xf32> to vector<2x128xf32>
    %19 = arith.addf %16, %18 : vector<2x128xf32>
    %cst_17 = arith.constant 0.000000e+00 : f32
    %20 = vector.broadcast %cst_17 : f32 to vector<2x128xf32>
    %21 = arith.maximumf %19, %20 : vector<2x128xf32>
    %c0_18 = arith.constant 0 : index
    %c0_19 = arith.constant 0 : index
    %22 = vector.load %arg7[%c0_18, %c0_19] : memref<128x64xf32, #tpu.memory_space<vmem>>, vector<128x64xf32>
    %cst_20 = arith.constant dense<0.000000e+00> : vector<2x64xf32>
    %23 = tpu.matmul %21, %22, %cst_20 {dimension_numbers = #tpu.dot_dimension_numbers<[1], [0], [0], [1], [0, 0, 1, 1], [], []>} : vector<2x128xf32>, vector<128x64xf32>, vector<2x64xf32> -> vector<2x64xf32>
    %c0_21 = arith.constant 0 : index
    %c0_22 = arith.constant 0 : index
    %24 = vector.load %arg8[%c0_21, %c0_22] : memref<1x64xf32, #tpu.memory_space<vmem>>, vector<1x64xf32>
    %25 = vector.broadcast %24 : vector<1x64xf32> to vector<2x64xf32>
    %26 = arith.addf %23, %25 : vector<2x64xf32>
    %cst_23 = arith.constant 0.000000e+00 : f32
    %27 = vector.broadcast %cst_23 : f32 to vector<2x64xf32>
    %28 = arith.maximumf %26, %27 : vector<2x64xf32>
    %c0_24 = arith.constant 0 : index
    %c0_25 = arith.constant 0 : index
    %29 = vector.load %arg9[%c0_24, %c0_25] : memref<64x12xf32, #tpu.memory_space<vmem>>, vector<64x12xf32>
    %cst_26 = arith.constant dense<0.000000e+00> : vector<2x12xf32>
    %30 = tpu.matmul %28, %29, %cst_26 {dimension_numbers = #tpu.dot_dimension_numbers<[1], [0], [0], [1], [0, 0, 1, 1], [], []>} : vector<2x64xf32>, vector<64x12xf32>, vector<2x12xf32> -> vector<2x12xf32>
    %c0_27 = arith.constant 0 : index
    %c0_28 = arith.constant 0 : index
    %31 = vector.load %arg10[%c0_27, %c0_28] : memref<1x12xf32, #tpu.memory_space<vmem>>, vector<1x12xf32>
    %32 = vector.broadcast %31 : vector<1x12xf32> to vector<2x12xf32>
    %33 = arith.addf %30, %32 : vector<2x12xf32>
    %c0_29 = arith.constant 0 : index
    %c0_30 = arith.constant 0 : index
    %34 = vector.load %arg11[%c0_29, %c0_30] : memref<2x12xf32, #tpu.memory_space<vmem>>, vector<2x12xf32>
    tpu.vector_store %arg11[%c0_29, %c0_30], %33 {strides = array<i32>} : memref<2x12xf32, #tpu.memory_space<vmem>>, vector<2x12xf32>,
    return
  }
}

</mosaic_0001>

<bundles_post_ra>
// kernel: bc_mlp_forward.1
= control target key start
LH: loop header
LB: loop body
LE: loop exit
PB: predicated region body
PF: predicated region fallthrough
CT: control target
= control target key end

     0   :  { %16 = vsyncpa [#allocation3], 0  ;;  %s1291_s0 = inlined_call_operand.vmem [shape: f32[2,27], index: 0, kind: input, shape index: {}]   ;;  %s1292_s1 = inlined_call_operand.hbm [shape: f32[27,256], index: 1, kind: input, shape index: {}]   ;;  %s1293_s2 = inlined_call_operand.vmem [shape: f32[1,256], index: 2, kind: input, shape index: {}]   ;;  %s1294_s3 = inlined_call_operand.hbm [shape: f32[256,256], index: 3, kind: input, shape index: {}]   ;;  %s1295_s4 = inlined_call_operand.vmem [shape: f32[1,256], index: 4, kind: input, shape index: {}]   ;;  %s1296_s5 = inlined_call_operand.vmem [shape: f32[256,128], index: 5, kind: input, shape index: {}]   ;;  %s1297_s6 = inlined_call_operand.vmem [shape: f32[1,128], index: 6, kind: input, shape index: {}]   ;;  %s1298_s7 = inlined_call_operand.vmem [shape: f32[128,64], index: 7, kind: input, shape index: {}]   ;;  %s1299_s8 = inlined_call_operand.vmem [shape: f32[1,64], index: 8, kind: input, shape index: {}]   ;;  %s1300_s9 = inlined_call_operand.vmem [shape: f32[64,12], index: 9, kind: input, shape index: {}]   ;;  %s1301_s10 = inlined_call_operand.vmem [shape: f32[1,12], index: 10, kind: input, shape index: {}]   ;;  %s1302_s11 = inlined_call_operand.hbm [shape: f32[2,12], index: 11, kind: output, shape index: {}]  }
   0x1   :  { %17 = vsyncpa [#allocation6], 0 }
   0x2   :  { %18 = vsyncpa [#allocation4], 0  ;;  %s977_s17 = smov [#allocation2]   ;;  %s905_s21 = scalar_lea.hbm %s1292_s1, 1024 }
   0x3   :  { %s26_s18 = sshll.u32 %s977_s17, 4  ;;  %p906_p0 = scmp.ne.s32.totalorder %s1292_s1, %s905_s21  ;;  %s27_s18 = int_to_ptr.vmem [resolvable:$true] %s26_s18 }
   0x4   :  { %p909_p1 = scmp.lt.u32.totalorder %s905_s21, %s1292_s1 }
   0x6   :  { %p911_p2 = pnand %p909_p1, %p906_p0 }
   0x8   :  { %914 = shalt.err (!%p911_p2)
}
   0x9   :  { %s915_s26 = scalar_lea.vmem %s27_s18, 1024  ;;  %p920_p4 = scmp.lt.s32.totalorder %s27_s18, %s27_s18 }
   0xa   :  { %p916_p3 = scmp.ne.s32.totalorder %s27_s18, %s915_s26  ;;  %p921_p5 = scmp.lt.s32.totalorder %s915_s26, %s915_s26 }
   0xc   :  { %p922_p6 = por %p921_p5, %p920_p4 }
   0xe   :  { %p923_p7 = pnand %p922_p6, %p916_p3 }
  0x10   :  { %926 = shalt.err (!%p923_p7)
}
  0x11   :  { %s978_s27 = smov 256   ;;  %s979_s28 = smov 16  }
  0x12   :  { %32 = dma.hbm_to_vmem [thread:$0]  %s1292_s1, 1024, %s27_s18, [#allocation3], %s978_s27, %s978_s27, %s979_s28  }
  0x13   :  { %s980_s12 = smov [#allocation5]   ;;  %s927_s16 = scalar_lea.hbm %s1294_s3, 8192 }
  0x14   :  { %s40_s13 = sshll.u32 %s980_s12, 4  ;;  %p928_p8 = scmp.ne.s32.totalorder %s1294_s3, %s927_s16  ;;  %s41_s13 = int_to_ptr.vmem [resolvable:$true] %s40_s13 }
  0x15   :  { %p931_p9 = scmp.lt.u32.totalorder %s927_s16, %s1294_s3 }
  0x17   :  { %p933_p10 = pnand %p931_p9, %p928_p8 }
  0x19   :  { %936 = shalt.err (!%p933_p10)
}
  0x1a   :  { %s937_s22 = scalar_lea.vmem %s41_s13, 8192  ;;  %p942_p12 = scmp.lt.s32.totalorder %s41_s13, %s41_s13 }
  0x1b   :  { %p938_p11 = scmp.ne.s32.totalorder %s41_s13, %s937_s22  ;;  %p943_p13 = scmp.lt.s32.totalorder %s937_s22, %s937_s22 }
  0x1d   :  { %p944_p0 = por %p943_p13, %p942_p12 }
  0x1f   :  { %p945_p1 = pnand %p944_p0, %p938_p11 }
  0x21   :  { %948 = shalt.err (!%p945_p1)
}
  0x22   :  { %46 = dma.hbm_to_vmem [thread:$0]  %s1294_s3, 8192, %s41_s13, [#allocation6], %s978_s27, %s978_s27, %s979_s28  }
  0x23   :  { %971 = dma.done.wait [#allocation3], 1024  }
  0x24   :  { %972 = vsyncadd [#allocation3], 4294966272 }
  0x25   :  { %973 = dma.done.wait [#allocation6], 8192  }
  0x26   :  { %974 = vsyncadd [#allocation6], 4294959104  ;;  %v981_v0 = vmov 0.0   ;;  %vm92_vm0 = vcmask 1042432   ;;  %v69_v1 = vld [vmem:[#allocation2 + $0x8] sm:$0xff]  ;;  %v71_v2 = vld [vmem:[#allocation2 + $0x18] sm:$0xff] }
  0x27   :  { %163 = vmatprep.mubr.f32.mxu0 %v981_v0  ;;  %v68_v3 = vld [vmem:[#allocation2] sm:$0xff]  ;;  %v754_v4 = vpack.c.bf16 %v71_v2, %v69_v1  ;;  %v70_v5 = vld [vmem:[#allocation2 + $0x10] sm:$0xff]  ;;  %v73_v6 = vld [vmem:[#allocation2 + $0x28] sm:$0xff]  ;;  %vm982_vm1 = vmmov 1   ;;  %vm88_vm3 = vcmask 220160   ;;  %vm984_vm4 = vmmov 0  }
  0x28   :  { %v75_v7 = vld [vmem:[#allocation2 + $0x38] sm:$0x7]  ;;  %v756_v8 = vpack.c.bf16 %v70_v5, %v68_v3  ;;  %vm1071_vm2 = vmpackc.low %vm92_vm0, %vm982_vm1  ;;  %v72_v11 = vld [vmem:[#allocation2 + $0x20] sm:$0xff]  ;;  %vm540_vm5 = vcmask 523264   ;;  %vm614_vm6 = vcmask 91136  }
  0x29   :  { %v758_v9 = vpack.c.bf16 %v75_v7, %v73_v6  ;;  %v74_v12 = vld [vmem:[#allocation2 + $0x30] sm:$0x7]  ;;  %755 = vmatprep.subr.bf16.mxu0 %v754_v4  ;;  %v173_v13 = vld [vmem:[#allocation5 + $0x8] sm:$0xff]  ;;  %v175_v14 = vld [vmem:[#allocation5 + $0x18] sm:$0xff] }
  0x2a   :  { %v172_v15 = vld [vmem:[#allocation5] sm:$0xff]  ;;  %757 = vmatpush1.bf16.msra.mxu0 %v756_v8  ;;  %v761_v16 = vpack.c.bf16 %v74_v12, %v72_v11  ;;  %v764_v17 = vpack.c.bf16 %v175_v14, %v173_v13  ;;  %v174_v18 = vld [vmem:[#allocation5 + $0x10] sm:$0xff]  ;;  %v177_v19 = vld [vmem:[#allocation5 + $0x28] sm:$0xff] }
  0x2b   :  { %v179_v20 = vld [vmem:[#allocation5 + $0x38] sm:$0xff]  ;;  %760 = vmatprep.subr.msk.bf16.mxu0 %vm1071_vm2, %v758_v9  ;;  %v766_v21 = vpack.c.bf16 %v174_v18, %v172_v15  ;;  %v176_v23 = vld [vmem:[#allocation5 + $0x20] sm:$0xff]  ;;  %v178_v24 = vld [vmem:[#allocation5 + $0x30] sm:$0xff] }
  0x2c   :  { %v768_v22 = vpack.c.bf16 %v179_v20, %v177_v19  ;;  %v181_v25 = vld [vmem:[#allocation5 + $0x48] sm:$0xff]  ;;  %765 = vmatprep.subr.bf16.mxu1 %v764_v17  ;;  %v183_v26 = vld [vmem:[#allocation5 + $0x58] sm:$0xff]  ;;  %v770_v27 = vpack.c.bf16 %v178_v24, %v176_v23  ;;  %v67_v28 = vld [vmem:[%s1291_s0] sm:$0x3] }
  0x2d   :  { %767 = vmatpush1.bf16.msra.mxu1 %v766_v21  ;;  %v772_v29 = vpack.c.bf16 %v183_v26, %v181_v25  ;;  %v180_v30 = vld [vmem:[#allocation5 + $0x40] sm:$0xff]  ;;  %v182_v31 = vld [vmem:[#allocation5 + $0x50] sm:$0xff]  ;;  %v185_v32 = vld [vmem:[#allocation5 + $0x68] sm:$0xff] }
  0x2e   :  { %763 = vmatpush1.bf16.msk.msra.mxu0 %vm1071_vm2, %v761_v16  ;;  %769 = vmatprep.subr.bf16.mxu1 %v768_v22  ;;  %v187_v33 = vld [vmem:[#allocation5 + $0x78] sm:$0xff]  ;;  %v774_v34 = vpack.c.bf16 %v182_v31, %v180_v30  ;;  %v184_v36 = vld [vmem:[#allocation5 + $0x60] sm:$0xff]  ;;  %v186_v37 = vld [vmem:[#allocation5 + $0x70] sm:$0xff] }
  0x2f   :  { %v776_v35 = vpack.c.bf16 %v187_v33, %v185_v32  ;;  %v189_v38 = vld [vmem:[#allocation5 + $0x88] sm:$0xff]  ;;  %v191_v39 = vld [vmem:[#allocation5 + $0x98] sm:$0xff]  ;;  %v778_v40 = vpack.c.bf16 %v186_v37, %v184_v36  ;;  %v188_v42 = vld [vmem:[#allocation5 + $0x80] sm:$0xff] }
  0x30   :  { %v780_v41 = vpack.c.bf16 %v191_v39, %v189_v38  ;;  %v190_v43 = vld [vmem:[#allocation5 + $0x90] sm:$0xff]  ;;  %v193_v44 = vld [vmem:[#allocation5 + $0xa8] sm:$0xff]  ;;  %v195_v45 = vld [vmem:[#allocation5 + $0xb8] sm:$0xff] }
  0x31   :  { %634 = vmatmul.mubr.msk.f32.vlgmr.msra.gmra.mrb[0].mxu0 %vm88_vm3, %v67_v28  ;;  %771 = vmatpush1.bf16.msra.mxu1 %v770_v27  ;;  %v782_v46 = vpack.c.bf16 %v190_v43, %v188_v42  ;;  %v784_v47 = vpack.c.bf16 %v195_v45, %v193_v44  ;;  %v192_v48 = vld [vmem:[#allocation5 + $0xa0] sm:$0xff]  ;;  %v194_v49 = vld [vmem:[#allocation5 + $0xb0] sm:$0xff]  ;;  %v197_v50 = vld [vmem:[#allocation5 + $0xc8] sm:$0xff] }
  0x32   :  { %773 = vmatprep.subr.bf16.mxu1 %v772_v29  ;;  %v199_v51 = vld [vmem:[#allocation5 + $0xd8] sm:$0xff]  ;;  %v786_v52 = vpack.c.bf16 %v194_v49, %v192_v48  ;;  %v196_v54 = vld [vmem:[#allocation5 + $0xc0] sm:$0xff]  ;;  %v198_v55 = vld [vmem:[#allocation5 + $0xd0] sm:$0xff] }
  0x33   :  { %v788_v53 = vpack.c.bf16 %v199_v51, %v197_v50  ;;  %v201_v56 = vld [vmem:[#allocation5 + $0xe8] sm:$0xff]  ;;  %v203_v57 = vld [vmem:[#allocation5 + $0xf8] sm:$0xff]  ;;  %v790_v58 = vpack.c.bf16 %v198_v55, %v196_v54  ;;  %v200_v60 = vld [vmem:[#allocation5 + $0xe0] sm:$0xff] }
  0x34   :  { %v792_v59 = vpack.c.bf16 %v203_v57, %v201_v56  ;;  %v202_v61 = vld [vmem:[#allocation5 + $0xf0] sm:$0xff]  ;;  %v205_v62 = vld [vmem:[#allocation5 + $0x108] sm:$0xff]  ;;  %v207_v63 = vld [vmem:[#allocation5 + $0x118] sm:$0xff] }
  0x35   :  { %775 = vmatpush1.bf16.msra.mxu1 %v774_v34  ;;  %v794_v1 = vpack.c.bf16 %v202_v61, %v200_v60  ;;  %v796_v2 = vpack.c.bf16 %v207_v63, %v205_v62  ;;  %v204_v3 = vld [vmem:[#allocation5 + $0x100] sm:$0xff]  ;;  %v206_v4 = vld [vmem:[#allocation5 + $0x110] sm:$0xff]  ;;  %v209_v5 = vld [vmem:[#allocation5 + $0x128] sm:$0xff] }
  0x36   :  { %777 = vmatprep.subr.bf16.mxu1 %v776_v35  ;;  %v211_v6 = vld [vmem:[#allocation5 + $0x138] sm:$0xff]  ;;  %v798_v7 = vpack.c.bf16 %v206_v4, %v204_v3  ;;  %v208_v9 = vld [vmem:[#allocation5 + $0x120] sm:$0xff]  ;;  %v210_v10 = vld [vmem:[#allocation5 + $0x130] sm:$0xff] }
  0x37   :  { %v800_v8 = vpack.c.bf16 %v211_v6, %v209_v5  ;;  %v213_v11 = vld [vmem:[#allocation5 + $0x148] sm:$0xff]  ;;  %v215_v12 = vld [vmem:[#allocation5 + $0x158] sm:$0xff]  ;;  %v802_v13 = vpack.c.bf16 %v210_v10, %v208_v9  ;;  %v212_v15 = vld [vmem:[#allocation5 + $0x140] sm:$0xff] }
  0x38   :  { %v804_v14 = vpack.c.bf16 %v215_v12, %v213_v11  ;;  %v214_v16 = vld [vmem:[#allocation5 + $0x150] sm:$0xff]  ;;  %v217_v17 = vld [vmem:[#allocation5 + $0x168] sm:$0xff]  ;;  %v219_v18 = vld [vmem:[#allocation5 + $0x178] sm:$0xff] }
  0x39   :  { %779 = vmatpush1.bf16.msra.mxu1 %v778_v40  ;;  %v806_v19 = vpack.c.bf16 %v214_v16, %v212_v15  ;;  %v808_v20 = vpack.c.bf16 %v219_v18, %v217_v17  ;;  %v216_v21 = vld [vmem:[#allocation5 + $0x160] sm:$0xff]  ;;  %v218_v22 = vld [vmem:[#allocation5 + $0x170] sm:$0xff]  ;;  %v221_v23 = vld [vmem:[#allocation5 + $0x188] sm:$0xff] }
  0x3a   :  { %781 = vmatprep.subr.bf16.mxu1 %v780_v41  ;;  %v223_v24 = vld [vmem:[#allocation5 + $0x198] sm:$0xff]  ;;  %v810_v25 = vpack.c.bf16 %v218_v22, %v216_v21  ;;  %v220_v27 = vld [vmem:[#allocation5 + $0x180] sm:$0xff]  ;;  %v222_v28 = vld [vmem:[#allocation5 + $0x190] sm:$0xff] }
  0x3b   :  { %v812_v26 = vpack.c.bf16 %v223_v24, %v221_v23  ;;  %v225_v29 = vld [vmem:[#allocation5 + $0x1a8] sm:$0xff]  ;;  %v227_v30 = vld [vmem:[#allocation5 + $0x1b8] sm:$0xff]  ;;  %v814_v31 = vpack.c.bf16 %v222_v28, %v220_v27  ;;  %v224_v33 = vld [vmem:[#allocation5 + $0x1a0] sm:$0xff]  ;;  %v78_v24 = vlaneseq }
  0x3c   :  { %v816_v32 = vpack.c.bf16 %v227_v30, %v225_v29  ;;  %v226_v34 = vld [vmem:[#allocation5 + $0x1b0] sm:$0xff]  ;;  %v229_v35 = vld [vmem:[#allocation5 + $0x1c8] sm:$0xff]  ;;  %v231_v36 = vld [vmem:[#allocation5 + $0x1d8] sm:$0xff] }
  0x3d   :  { %783 = vmatpush1.bf16.msra.mxu1 %v782_v46  ;;  %v818_v37 = vpack.c.bf16 %v226_v34, %v224_v33  ;;  %v820_v38 = vpack.c.bf16 %v231_v36, %v229_v35  ;;  %v228_v39 = vld [vmem:[#allocation5 + $0x1c0] sm:$0xff]  ;;  %v230_v40 = vld [vmem:[#allocation5 + $0x1d0] sm:$0xff]  ;;  %v233_v42 = vld [vmem:[#allocation5 + $0x1e8] sm:$0xff] }
  0x3e   :  { %785 = vmatprep.subr.bf16.mxu1 %v784_v47  ;;  %v822_v41 = vpack.c.bf16 %v230_v40, %v228_v39  ;;  %v235_v43 = vld [vmem:[#allocation5 + $0x1f8] sm:$0xff]  ;;  %v232_v45 = vld [vmem:[#allocation5 + $0x1e0] sm:$0xff]  ;;  %v234_v46 = vld [vmem:[#allocation5 + $0x1f0] sm:$0xff] }
  0x3f   :  { %v824_v44 = vpack.c.bf16 %v235_v43, %v233_v42  ;;  %v826_v47 = vpack.c.bf16 %v234_v46, %v232_v45  ;;  %v337_v48 = vld [vmem:[%s1296_s5 + $0x80] sm:$0xff]  ;;  %v338_v49 = vld [vmem:[%s1296_s5 + $0x88] sm:$0xff]  ;;  %v340_v54 = vld [vmem:[%s1296_s5 + $0x98] sm:$0xff]  ;;  %v983_v46 = vmov 0.0|0.0  }
  0x40   :  { %v321_v50 = vld [vmem:[%s1296_s5] sm:$0xff]  ;;  %v828_v51 = vpack.c.bf16 %v338_v49, %v337_v48  ;;  %v323_v57 = vld [vmem:[%s1296_s5 + $0x10] sm:$0xff]  ;;  %v342_v60 = vld [vmem:[%s1296_s5 + $0xa8] sm:$0xff] }
  0x41   :  { %787 = vmatpush1.bf16.msra.mxu1 %v786_v52  ;;  %v322_v52 = vld [vmem:[%s1296_s5 + $0x8] sm:$0xff]  ;;  %v325_v63 = vld [vmem:[%s1296_s5 + $0x20] sm:$0xff]  ;;  %v344_v3 = vld [vmem:[%s1296_s5 + $0xb8] sm:$0xff] }
  0x42   :  { %789 = vmatprep.subr.bf16.mxu1 %v788_v53  ;;  %v339_v53 = vld [vmem:[%s1296_s5 + $0x90] sm:$0xff]  ;;  %v830_v55 = vpack.c.bf16 %v322_v52, %v321_v50  ;;  %829 = vmatprep.subr.bf16.mxu0 %v828_v51  ;;  %v346_v9 = vld [vmem:[%s1296_s5 + $0xc8] sm:$0xff]  ;;  %v329_v12 = vld [vmem:[%s1296_s5 + $0x40] sm:$0xff] }
  0x43   :  { %v832_v56 = vpack.c.bf16 %v340_v54, %v339_v53  ;;  %v327_v6 = vld [vmem:[%s1296_s5 + $0x30] sm:$0xff]  ;;  %v348_v15 = vld [vmem:[%s1296_s5 + $0xd8] sm:$0xff]  ;;  %v350_v21 = vld [vmem:[%s1296_s5 + $0xe8] sm:$0xff] }
  0x44   :  { %831 = vmatpush3.bf16.msra.mxu0 %v830_v55  ;;  %v331_v18 = vld [vmem:[%s1296_s5 + $0x50] sm:$0xff]  ;;  %v76_v27 = vld [vmem:[%s1293_s2] sm:$0x3]  ;;  %v432_v54 = vld [vmem:[%s1298_s7 + $0x8] sm:$0xff] }
  0x45   :  { %791 = vmatpush1.bf16.msra.mxu1 %v790_v58  ;;  %v324_v58 = vld [vmem:[%s1296_s5 + $0x18] sm:$0xff]  ;;  %833 = vmatprep.subr.bf16.mxu0 %v832_v56  ;;  %v351_v40 = vld [vmem:[%s1296_s5 + $0xf0] sm:$0xff]  ;;  %v431_v53 = vld [vmem:[%s1298_s7] sm:$0xff] }
  0x46   :  { %793 = vmatprep.subr.bf16.mxu1 %v792_v59  ;;  %v341_v59 = vld [vmem:[%s1296_s5 + $0xa0] sm:$0xff]  ;;  %v834_v61 = vpack.c.bf16 %v324_v58, %v323_v57  ;;  %v335_v43 = vld [vmem:[%s1296_s5 + $0x70] sm:$0xff]  ;;  %v861_v57 = vpack.c.bf16 %v432_v54, %v431_v53 }
  0x47   :  { %v836_v62 = vpack.c.bf16 %v342_v60, %v341_v59  ;;  %v433_v59 = vld [vmem:[%s1298_s7 + $0x10] sm:$0xff]  ;;  %v434_v60 = vld [vmem:[%s1298_s7 + $0x18] sm:$0xff] }
  0x48   :  { %835 = vmatpush3.bf16.msra.mxu0 %v834_v61  ;;  %v864_v61 = vpack.c.bf16 %v434_v60, %v433_v59 }
  0x49   :  { %795 = vmatpush1.bf16.msra.mxu1 %v794_v1  ;;  %v326_v1 = vld [vmem:[%s1296_s5 + $0x28] sm:$0xff]  ;;  %837 = vmatprep.subr.bf16.mxu0 %v836_v62  ;;  %v435_v62 = vld [vmem:[%s1298_s7 + $0x20] sm:$0xff] }
  0x4a   :  { %797 = vmatprep.subr.bf16.mxu1 %v796_v2  ;;  %v343_v2 = vld [vmem:[%s1296_s5 + $0xb0] sm:$0xff]  ;;  %v838_v4 = vpack.c.bf16 %v326_v1, %v325_v63  ;;  %v436_v63 = vld [vmem:[%s1298_s7 + $0x28] sm:$0xff] }
  0x4b   :  { %v840_v5 = vpack.c.bf16 %v344_v3, %v343_v2  ;;  %v867_v1 = vpack.c.bf16 %v436_v63, %v435_v62  ;;  %v437_v2 = vld [vmem:[%s1298_s7 + $0x30] sm:$0xff]  ;;  %v438_v3 = vld [vmem:[%s1298_s7 + $0x38] sm:$0xff] }
  0x4c   :  { %839 = vmatpush3.bf16.msra.mxu0 %v838_v4  ;;  %v870_v4 = vpack.c.bf16 %v438_v3, %v437_v2 }
  0x4d   :  { %799 = vmatpush1.bf16.msra.mxu1 %v798_v7  ;;  %v328_v7 = vld [vmem:[%s1296_s5 + $0x38] sm:$0xff]  ;;  %841 = vmatprep.subr.bf16.mxu0 %v840_v5  ;;  %v439_v5 = vld [vmem:[%s1298_s7 + $0x40] sm:$0xff] }
  0x4e   :  { %801 = vmatprep.subr.bf16.mxu1 %v800_v8  ;;  %v345_v8 = vld [vmem:[%s1296_s5 + $0xc0] sm:$0xff]  ;;  %v842_v10 = vpack.c.bf16 %v328_v7, %v327_v6  ;;  %v440_v6 = vld [vmem:[%s1298_s7 + $0x48] sm:$0xff] }
  0x4f   :  { %v844_v11 = vpack.c.bf16 %v346_v9, %v345_v8  ;;  %v873_v7 = vpack.c.bf16 %v440_v6, %v439_v5  ;;  %v441_v8 = vld [vmem:[%s1298_s7 + $0x50] sm:$0xff]  ;;  %v442_v9 = vld [vmem:[%s1298_s7 + $0x58] sm:$0xff] }
  0x50   :  { %843 = vmatpush3.bf16.msra.mxu0 %v842_v10  ;;  %v876_v10 = vpack.c.bf16 %v442_v9, %v441_v8 }
  0x51   :  { %803 = vmatpush1.bf16.msra.mxu1 %v802_v13  ;;  %v330_v13 = vld [vmem:[%s1296_s5 + $0x48] sm:$0xff]  ;;  %845 = vmatprep.subr.bf16.mxu0 %v844_v11  ;;  %v443_v11 = vld [vmem:[%s1298_s7 + $0x60] sm:$0xff] }
  0x52   :  { %805 = vmatprep.subr.bf16.mxu1 %v804_v14  ;;  %v347_v14 = vld [vmem:[%s1296_s5 + $0xd0] sm:$0xff]  ;;  %v846_v16 = vpack.c.bf16 %v330_v13, %v329_v12  ;;  %v444_v12 = vld [vmem:[%s1298_s7 + $0x68] sm:$0xff] }
  0x53   :  { %v848_v17 = vpack.c.bf16 %v348_v15, %v347_v14  ;;  %v879_v13 = vpack.c.bf16 %v444_v12, %v443_v11  ;;  %v445_v14 = vld [vmem:[%s1298_s7 + $0x70] sm:$0xff]  ;;  %v446_v15 = vld [vmem:[%s1298_s7 + $0x78] sm:$0xff] }
  0x54   :  { %847 = vmatpush3.bf16.msra.mxu0 %v846_v16  ;;  %v882_v16 = vpack.c.bf16 %v446_v15, %v445_v14 }
  0x55   :  { %807 = vmatpush1.bf16.msra.mxu1 %v806_v19  ;;  %v332_v19 = vld [vmem:[%s1296_s5 + $0x58] sm:$0xff]  ;;  %849 = vmatprep.subr.bf16.mxu0 %v848_v17  ;;  %v525_v17 = vld [vmem:[%s1300_s9] sm:$0xff] }
  0x56   :  { %809 = vmatprep.subr.bf16.mxu1 %v808_v20  ;;  %v349_v20 = vld [vmem:[%s1296_s5 + $0xe0] sm:$0xff]  ;;  %v850_v22 = vpack.c.bf16 %v332_v19, %v331_v18  ;;  %v526_v18 = vld [vmem:[%s1300_s9 + $0x8] sm:$0xff]  ;;  %v527_v19 = vld [vmem:[%s1300_s9 + $0x10] sm:$0xff] }
  0x57   :  { %v852_v23 = vpack.c.bf16 %v350_v21, %v349_v20  ;;  %v885_v20 = vpack.c.bf16 %v526_v18, %v525_v17  ;;  %v528_v21 = vld [vmem:[%s1300_s9 + $0x18] sm:$0xff] }
  0x58   :  { %851 = vmatpush3.bf16.msra.mxu0 %v850_v22  ;;  %v888_v22 = vpack.c.bf16 %v528_v21, %v527_v19 }
  0x59   :  { %811 = vmatpush1.bf16.msra.mxu1 %v810_v25  ;;  %853 = vmatprep.subr.bf16.mxu0 %v852_v23  ;;  %v79_v25 = vshrl.u32 %v78_v24, 7  ;;  %v530_v23 = vld [vmem:[%s1300_s9 + $0x28] sm:$0xff] }
  0x5a   :  { %813 = vmatprep.subr.bf16.mxu1 %v812_v26 }
  0x5b   :  { %v80_v26 = vsub.s32 0, %v79_v25  ;;  %v84_v28 = vsub.s32 1, %v79_v25 }
  0x5d   :  { %815 = vmatpush1.bf16.msra.mxu1 %v814_v31  ;;  %v81_v29 = vrot.slane %v76_v27, %v80_v26  ;;  %v85_v30 = vrot.slane %v76_v27, %v84_v28 }
  0x5e   :  { %817 = vmatprep.subr.bf16.mxu1 %v816_v32 }
  0x61   :  { %819 = vmatpush1.bf16.msra.mxu1 %v818_v37  ;;  %v333_v37 = vld [vmem:[%s1296_s5 + $0x60] sm:$0xff] }
  0x62   :  { %821 = vmatprep.subr.bf16.mxu1 %v820_v38  ;;  %v334_v38 = vld [vmem:[%s1296_s5 + $0x68] sm:$0xff] }
  0x63   :  { %v854_v39 = vpack.c.bf16 %v334_v38, %v333_v37 }
  0x65   :  { %823 = vmatpush1.bf16.msra.mxu1 %v822_v41  ;;  %855 = vmatpush3.bf16.msra.mxu0 %v854_v39  ;;  %v352_v41 = vld [vmem:[%s1296_s5 + $0xf8] sm:$0xff]  ;;  %v637_v39 = vld [vmem:[%s1301_s10] ss:$0 sm:$0xff] }
  0x66   :  { %825 = vmatprep.subr.bf16.mxu1 %v824_v44  ;;  %v856_v42 = vpack.c.bf16 %v352_v41, %v351_v40  ;;  %v336_v44 = vld [vmem:[%s1296_s5 + $0x78] sm:$0xff]  ;;  %s985_s5 = smov [#allocation7]  }
  0x67   :  { %v858_v45 = vpack.c.bf16 %v336_v44, %v335_v43  ;;  %s622_s26 = sshll.u32 %s985_s5, 4  ;;  %s623_s26 = int_to_ptr.vmem [resolvable:$true] %s622_s26 }
  0x68   :  { %857 = vmatprep.subr.bf16.mxu0 %v856_v42  ;;  %p954_p3 = scmp.lt.s32.totalorder %s623_s26, %s623_s26 }
  0x69   :  { %827 = vmatpush1.bf16.msra.mxu1 %v826_v47  ;;  %859 = vmatpush3.bf16.msra.mxu0 %v858_v45  ;;  %v236_v47 = vld [vmem:[%s1295_s4] sm:$0x3] }
  0x6a   :  { %860 = vmatprep.subr.bf16.mxu0 %v983_v46  ;;  %884 = vmatprep.subr.bf16.mxu1 %v983_v46  ;;  %v241_v48 = vrot.slane %v236_v47, %v80_v26  ;;  %v245_v49 = vrot.slane %v236_v47, %v84_v28  ;;  %v635_v26 = vld [vmem:[%s1297_s6] ss:$0 sm:$0xff] }
 0x104   :  { %v165_v31 = vpop.f32.mrb[0].mxu0 }
 0x105   :  { %v166_v32 = vadd.f32 %v165_v31, %v81_v29  ;;  %v167_v33 = vpop.f32.mrb[1].mxu0  ;;  %v531_v31 = vld [vmem:[%s1300_s9 + $0x30] sm:$0xff] }
 0x106   :  { %v168_v34 = vadd.f32 %v167_v33, %v85_v30 }
 0x107   :  { %v170_v36 = vmax.f32 %v166_v32, 0.0  ;;  %v532_v32 = vld [vmem:[%s1300_s9 + $0x38] sm:$0xff] }
 0x108   :  { %v171_v35 = vmax.f32 %v168_v34, 0.0  ;;  %v894_v33 = vpack.c.bf16 %v532_v32, %v531_v31  ;;  %v636_v34 = vld [vmem:[%s1299_s8] ss:$0 sm:$0xff] }
 0x10a   :  { %312 = vmatprep.mubr.f32.mxu1 %v171_v35 }
 0x10b   :  { %313 = vmatmul.mubr.f32.vlgmr.msra.gmra.mrb[0].mxu1 %v170_v36 }
 0x10c   :  { %751 = vmatprep.mubr.msk.f32.mxu1 %vm984_vm4, %v981_v0  ;;  %886 = vmatpush3.bf16.msra.mxu1 %v885_v20 }
 0x10d   :  { %887 = vmatprep.subr.bf16.mxu1 %v983_v46 }
 0x110   :  { %889 = vmatpush3.bf16.msra.mxu1 %v888_v22 }
 0x111   :  { %890 = vmatprep.subr.bf16.mxu1 %v983_v46 }
 0x1de   :  { %v314_v50 = vpop.f32.mrb[0].mxu1 }
 0x1df   :  { %v315_v51 = vadd.f32 %v314_v50, %v241_v48  ;;  %v316_v52 = vpop.f32.mrb[1].mxu1 }
 0x1e0   :  { %v317_v55 = vadd.f32 %v316_v52, %v245_v49 }
 0x1e1   :  { %v319_v58 = vmax.f32 %v315_v51, 0.0 }
 0x1e2   :  { %v320_v56 = vmax.f32 %v317_v55, 0.0 }
 0x1e4   :  { %424 = vmatprep.mubr.f32.mxu0 %v320_v56 }
 0x1e5   :  { %425 = vmatmul.mubr.f32.vlgmr.msra.gmra.mrb[2].mxu0 %v319_v58 }
 0x1e6   :  { %862 = vmatpush3.bf16.msra.mxu0 %v861_v57  ;;  %732 = vmatprep.mubr.msk.f32.mxu0 %vm984_vm4, %v981_v0  ;;  %v529_v0 = vld [vmem:[%s1300_s9 + $0x20] sm:$0xff]  ;;  %s949_s9 = scalar_lea.vmem %s623_s26, 32 }
 0x1e7   :  { %863 = vmatprep.subr.bf16.mxu0 %v983_v46  ;;  %v891_v24 = vpack.c.bf16 %v530_v23, %v529_v0  ;;  %p950_p2 = scmp.ne.s32.totalorder %s623_s26, %s949_s9  ;;  %p955_p4 = scmp.lt.s32.totalorder %s949_s9, %s949_s9 }
 0x1e9   :  { %892 = vmatpush3.bf16.msra.mxu1 %v891_v24  ;;  %p956_p5 = por %p955_p4, %p954_p3 }
 0x1ea   :  { %865 = vmatpush3.bf16.msra.mxu0 %v864_v61  ;;  %893 = vmatprep.subr.bf16.mxu1 %v983_v46 }
 0x1eb   :  { %866 = vmatprep.subr.bf16.mxu0 %v983_v46  ;;  %p957_p6 = pnand %p956_p5, %p950_p2 }
 0x1ed   :  { %895 = vmatpush3.bf16.msra.mxu1 %v894_v33 }
 0x1ee   :  { %868 = vmatpush3.bf16.msra.mxu0 %v867_v1 }
 0x1ef   :  { %869 = vmatprep.subr.bf16.mxu0 %v983_v46 }
 0x1f2   :  { %871 = vmatpush3.bf16.msra.mxu0 %v870_v4 }
 0x1f3   :  { %872 = vmatprep.subr.bf16.mxu0 %v983_v46 }
 0x1f6   :  { %874 = vmatpush3.bf16.msra.mxu0 %v873_v7 }
 0x1f7   :  { %875 = vmatprep.subr.bf16.mxu0 %v983_v46 }
 0x1fa   :  { %877 = vmatpush3.bf16.msra.mxu0 %v876_v10 }
 0x1fb   :  { %878 = vmatprep.subr.bf16.mxu0 %v983_v46 }
 0x1fe   :  { %880 = vmatpush3.bf16.msra.mxu0 %v879_v13 }
 0x1ff   :  { %881 = vmatprep.subr.bf16.mxu0 %v983_v46 }
 0x202   :  { %883 = vmatpush3.bf16.msra.mxu0 %v882_v16 }
 0x2b8   :  { %v671_v25 = vpop.f32.mrb[2].mxu0 }
 0x2b9   :  { %v672_v27 = vpop.f32.mrb[3].mxu0 }
 0x2ba   :  { %v673_v28 = vadd.f32 %v672_v27, %v671_v25 }
 0x2bc   :  { %v427_v29 = vadd.f32 %v673_v28, %v635_v26 }
 0x2be   :  { %v430_v30 = vmax.f32 %v427_v29, 0.0 }
 0x2c0   :  { %733 = vmatmul.mubr.f32.vlgmr.msra.gmra.mrb[4].mxu0 %v430_v30 }
 0x393   :  { %v520_v35 = vpop.f32.mrb[4].mxu0 }
 0x394   :  { %v521_v36 = vadd.f32 %v636_v34, %v520_v35  ;;  %v734_v37 = vpop.f32.mrb[5].mxu0 }
 0x396   :  { %v524_v38 = vmax.f32 %v521_v36, 0.0 }
 0x398   :  { %752 = vmatmul.mubr.msk.f32.vlgmr.msra.gmra.mrb[2].mxu1 %vm540_vm5, %v524_v38 }
 0x46b   :  { %v610_v40 = vpop.f32.mrb[2].mxu1 }
 0x46c   :  { %v611_v41 = vadd.f32 %v637_v39, %v610_v40  ;;  %v753_v42 = vpop.f32.mrb[3].mxu1 }
 0x46e   :  { %615 = vst.msk [vmem:[#allocation7] sm:$0x3] %vm614_vm6, %v611_v41 }
 0x46f   :  { %960 = shalt.err (!%p957_p6)
}
 0x470   :  { %s961_s28 = scalar_lea.hbm %s1302_s11, 32 }
 0x471   :  { %p962_p7 = scmp.ne.s32.totalorder %s1302_s11, %s961_s28  ;;  %p965_p8 = scmp.lt.u32.totalorder %s961_s28, %s1302_s11 }
 0x473   :  { %p967_p9 = pnand %p965_p8, %p962_p7 }
 0x475   :  { %970 = shalt.err (!%p967_p9)
}
 0x476   :  { %625 = dma.vmem_to_hbm [thread:$0]  %s623_s26, 32, %s1302_s11, [#allocation4]  }
 0x477   :  { %975 = dma.done.wait [#allocation4], 32  }
 0x478   :  { %976 = vsyncadd [#allocation4], 4294967264 }
 0x479   :  { %629 = vsyncpa [#allocation3], 1 }
 0x47a   :  { %630 = vsyncpa [#allocation6], 1 }
 0x47b   :  { %631 = vsyncpa [#allocation4], 1 }

</bundles_post_ra>
